<compile_context>
chip_gen: v6e
topology: v6e:2x2x1
jax: 0.10.0
libtpu: 0.0.40
codegen_flags: <defaults>
</compile_context>

<pallas_src>
import functools

import jax
import jax.numpy as jnp
from jax import lax
from jax.experimental import pallas as pl
from jax.experimental.pallas import tpu as pltpu

VOCAB = 32320
EMBED = 1024
P_DROP = 0.2
_KEEP_THRESHOLD = int(P_DROP * (1 << 32))   # drop element if hash(bits) < this
_INV_KEEP = 1.0 / (1.0 - P_DROP)
_N_SEMS = 8                                  # outstanding-DMA window


def _round_up(x, m):
    return ((x + m - 1) // m) * m


def _hash_u32(x, seed_u32):
    """splitmix32-style mixer on uint32; pure VPU integer ops."""
    x = x ^ (seed_u32 * jnp.uint32(0x9E3779B9))
    x = x ^ (x >> jnp.uint32(16))
    x = x * jnp.uint32(0x7FEB352D)
    x = x ^ (x >> jnp.uint32(15))
    x = x * jnp.uint32(0x846CA68B)
    x = x ^ (x >> jnp.uint32(16))
    return x


def _embed_dropout_kernel(idx_ref, seed_ref, table_ref, out_ref, dma_sems, *,
                          block_tokens, apply_dropout):
    # idx_ref, seed_ref : SMEM scalar-prefetched token ids / seed
    # table_ref         : (VOCAB, EMBED) f32, resident in HBM (pl.ANY)
    # out_ref           : (block_tokens, EMBED) f32 VMEM output tile
    # dma_sems          : (_N_SEMS,) DMA semaphores (round-robin)
    blk = pl.program_id(0)
    base = blk * block_tokens

    def gather_copy(t):
        tok = idx_ref[base + t]
        return pltpu.make_async_copy(
            table_ref.at[pl.ds(tok, 1), :],
            out_ref.at[pl.ds(t, 1), :],
            dma_sems.at[t % _N_SEMS])

    # Issue all row-gather DMAs for this block (keeps many 4 KiB copies in
    # flight to hide HBM latency), then drain them in order.
    def issue(t, carry):
        gather_copy(t).start()
        return carry

    lax.fori_loop(0, block_tokens, issue, 0)

    def drain(t, carry):
        gather_copy(t).wait()
        return carry

    lax.fori_loop(0, block_tokens, drain, 0)

    if apply_dropout:
        seed_u32 = seed_ref[0].astype(jnp.uint32)
        rows = lax.broadcasted_iota(jnp.int32, (block_tokens, EMBED), 0)
        cols = lax.broadcasted_iota(jnp.int32, (block_tokens, EMBED), 1)
        gidx = ((base + rows) * EMBED + cols).astype(jnp.uint32)
        bits = _hash_u32(gidx, seed_u32)
        keep = bits >= jnp.uint32(_KEEP_THRESHOLD)
        out_ref[...] = jnp.where(keep,
                                 out_ref[...] * jnp.float32(_INV_KEEP),
                                 jnp.float32(0.0))
    # else: eval path — gathered rows are already in the output tile; no
    # extra load/store through vregs.


def embed1_forward(table, src, src_length, tgt_input, *, seed=0,
                   apply_dropout=True, block_tokens=256):
    """Pallas implementation of embed1.forward((src, src_length, tgt_input))."""
    seq_len, batch = src.shape
    n_tok = seq_len * batch

    # Token block size: multiple of 8 (sublane-dense output tiles), capped so
    # small inputs don't allocate oversized tiles.
    tb = min(block_tokens, _round_up(n_tok, 8))
    tb = max(8, (tb // 8) * 8)
    n_blocks = pl.cdiv(n_tok, tb)
    n_pad = n_blocks * tb

    flat_idx = src.reshape(n_tok).astype(jnp.int32)
    if n_pad != n_tok:
        flat_idx = jnp.concatenate(
            [flat_idx, jnp.zeros((n_pad - n_tok,), jnp.int32)])
    seed_arr = jnp.array([seed], dtype=jnp.int32)

    kernel = functools.partial(_embed_dropout_kernel,
                               block_tokens=tb,
                               apply_dropout=apply_dropout)

    bytes_accessed = 2 * n_pad * EMBED * 4 + n_pad * 4   # gather read + write + ids

    out_flat = pl.pallas_call(
        kernel,
        out_shape=jax.ShapeDtypeStruct((n_pad, EMBED), jnp.float32),
        grid_spec=pltpu.PrefetchScalarGridSpec(
            num_scalar_prefetch=2,            # (flat_idx, seed) land in SMEM
            grid=(n_blocks,),
            in_specs=[
                pl.BlockSpec(memory_space=pl.ANY),   # table stays in HBM
            ],
            out_specs=pl.BlockSpec((tb, EMBED),
                                   lambda i, idx_ref, seed_ref: (i, 0)),
            scratch_shapes=[pltpu.SemaphoreType.DMA((_N_SEMS,))],
        ),
        compiler_params=pltpu.CompilerParams(
            dimension_semantics=("parallel",)),
        cost_estimate=pl.CostEstimate(flops=0, transcendentals=0,
                                      bytes_accessed=bytes_accessed),
    )(flat_idx, seed_arr, table)

    out = out_flat[:n_tok].reshape(seq_len, batch, EMBED)
    # src_length and tgt_input are passed through untouched, as in the module.
    return out, src_length, tgt_input


def _init_params(key):
    # nn.init.uniform_(embed.weight, -0.1, 0.1) overwrites every row
    # (including padding_idx=0), so the table is plain U(-0.1, 0.1).
    return jax.random.uniform(key, (VOCAB, EMBED), dtype=jnp.float32,
                              minval=-0.1, maxval=0.1)


if __name__ == "__main__":
    key = jax.random.PRNGKey(0)
    k_tab, k_src, k_tgt = jax.random.split(key, 3)

    seq_len, batch = 8, 2
    table = _init_params(k_tab)
    src = jax.random.randint(k_src, (seq_len, batch), 1, VOCAB, dtype=jnp.int32)
    src_length = jnp.full((batch,), seq_len, dtype=jnp.int32)
    tgt_input = jax.random.randint(k_tgt, (seq_len + 1, batch), 1, VOCAB,
                                   dtype=jnp.int32)

    ref = jnp.take(table, src.reshape(-1), axis=0).reshape(seq_len, batch, EMBED)

    # Eval-mode semantics (dropout disabled): pure gather, must match exactly.
    out_eval, _, _ = embed1_forward(table, src, src_length, tgt_input,
                                    apply_dropout=False)
    out_eval = jax.block_until_ready(out_eval)
    assert jnp.array_equal(out_eval, ref), "embedding gather mismatch"

    # Training-mode forward (embedding + dropout), the module's default mode.
    out, sl, ti = embed1_forward(table, src, src_length, tgt_input,
                                 seed=1234, apply_dropout=True)
    out = jax.block_until_ready(out)
    assert out.shape == (seq_len, batch, EMBED)
    assert out.dtype == jnp.float32
    assert sl.shape == (batch,) and ti.shape == (seq_len + 1, batch)

    # Kept elements equal ref * 1/(1-p); dropped elements are zero; drop rate
    # is ~p = 0.2.
    kept = out != 0.0
    scaled_ref = ref * jnp.float32(_INV_KEEP)
    assert jnp.allclose(jnp.where(kept, out, scaled_ref), scaled_ref,
                        rtol=1e-6, atol=1e-7), "dropout scaling mismatch"
    drop_frac = 1.0 - jnp.mean(kept.astype(jnp.float32))
    assert 0.1 < float(drop_frac) < 0.3, f"drop fraction off: {drop_frac}"

    print("KERNEL_OK")
</pallas_src>

<mosaic_0001>
module attributes {stable_mosaic.version = 11 : i64} {
  func.func @_embed_dropout_kernel(%arg0: i32, %arg1: memref<16xi32, #tpu.memory_space<smem>>, %arg2: memref<1xi32, #tpu.memory_space<smem>>, %arg3: memref<32320x1024xf32, #tpu.memory_space<any>>, %arg4: memref<16x1024xf32, #tpu.memory_space<vmem>>, %arg5: memref<8x!tpu.dma_semaphore, #tpu.memory_space<semaphore_mem>>) attributes {dimension_semantics = [#tpu.dimension_semantics<parallel>], iteration_bounds = array<i64: 1>, scalar_prefetch = 2 : i64, scratch_operands = 1 : i64, tpu.core_type = #tpu.core_type<tc>, window_params = [{}, {transform_indices = @transform_1, window_bounds = array<i64: 16, 1024>}]} {
    %c16_i32 = arith.constant 16 : i32
    %0 = arith.muli %arg0, %c16_i32 : i32
    %c0_i32 = arith.constant 0 : i32
    %c16_i32_0 = arith.constant 16 : i32
    %1 = arith.addi %c0_i32, %c16_i32_0 : i32
    %c1_i32 = arith.constant 1 : i32
    scf.for %arg6 = %c0_i32 to %1 step %c1_i32  : i32 {
      %3 = arith.addi %0, %arg6 : i32
      %4 = arith.index_cast %3 : i32 to index
      %5 = memref.load %arg1[%4] : memref<16xi32, #tpu.memory_space<smem>>
      %c8_i32 = arith.constant 8 : i32
      %c0_i32_6 = arith.constant 0 : i32
      %6 = arith.cmpi eq, %c8_i32, %c0_i32_6 : i32
      %c1_i32_7 = arith.constant 1 : i32
      %7 = arith.select %6, %c1_i32_7, %c8_i32 : i32
      %8 = arith.remsi %arg6, %7 : i32
      %c0_i32_8 = arith.constant 0 : i32
      %9 = arith.cmpi ne, %8, %c0_i32_8 : i32
      %c0_i32_9 = arith.constant 0 : i32
      %10 = arith.cmpi slt, %8, %c0_i32_9 : i32
      %c0_i32_10 = arith.constant 0 : i32
      %11 = arith.cmpi slt, %7, %c0_i32_10 : i32
      %12 = arith.xori %10, %11 : i1
      %13 = arith.andi %12, %9 : i1
      %14 = arith.addi %8, %7 : i32
      %15 = arith.select %13, %14, %8 : i32
      %c0_i32_11 = arith.constant 0 : i32
      %16 = tpu.memref_slice %arg3[%5, %c0_i32_11] : memref<32320x1024xf32, #tpu.memory_space<any>> -> memref<1x1024xf32, #tpu.memory_space<any>>
      %c0_i32_12 = arith.constant 0 : i32
      %17 = tpu.memref_slice %arg4[%arg6, %c0_i32_12] : memref<16x1024xf32, #tpu.memory_space<vmem>> -> memref<1x1024xf32, #tpu.memory_space<vmem>>
      %18 = tpu.memref_slice %arg5[%15] : memref<8x!tpu.dma_semaphore, #tpu.memory_space<semaphore_mem>> -> memref<1x!tpu.dma_semaphore, #tpu.memory_space<semaphore_mem>>
      %19 = tpu.memref_squeeze %18 : memref<1x!tpu.dma_semaphore, #tpu.memory_space<semaphore_mem>> -> memref<!tpu.dma_semaphore, #tpu.memory_space<semaphore_mem>>
      tpu.enqueue_dma source(%16 : memref<1x1024xf32, #tpu.memory_space<any>>) target(%17 : memref<1x1024xf32, #tpu.memory_space<vmem>>) target_semaphore(%19 : memref<!tpu.dma_semaphore, #tpu.memory_space<semaphore_mem>>)
    }
    %c16_i32_1 = arith.constant 16 : i32
    %c0_i32_2 = arith.constant 0 : i32
    %c16_i32_3 = arith.constant 16 : i32
    %2 = arith.addi %c0_i32_2, %c16_i32_3 : i32
    %c1_i32_4 = arith.constant 1 : i32
    scf.for %arg6 = %c0_i32_2 to %2 step %c1_i32_4  : i32 {
      %3 = arith.addi %0, %arg6 : i32
      %4 = arith.index_cast %3 : i32 to index
      %5 = memref.load %arg1[%4] : memref<16xi32, #tpu.memory_space<smem>>
      %c8_i32 = arith.constant 8 : i32
      %c0_i32_6 = arith.constant 0 : i32
      %6 = arith.cmpi eq, %c8_i32, %c0_i32_6 : i32
      %c1_i32_7 = arith.constant 1 : i32
      %7 = arith.select %6, %c1_i32_7, %c8_i32 : i32
      %8 = arith.remsi %arg6, %7 : i32
      %c0_i32_8 = arith.constant 0 : i32
      %9 = arith.cmpi ne, %8, %c0_i32_8 : i32
      %c0_i32_9 = arith.constant 0 : i32
      %10 = arith.cmpi slt, %8, %c0_i32_9 : i32
      %c0_i32_10 = arith.constant 0 : i32
      %11 = arith.cmpi slt, %7, %c0_i32_10 : i32
      %12 = arith.xori %10, %11 : i1
      %13 = arith.andi %12, %9 : i1
      %14 = arith.addi %8, %7 : i32
      %15 = arith.select %13, %14, %8 : i32
      %c0_i32_11 = arith.constant 0 : i32
      %16 = tpu.memref_slice %arg3[%5, %c0_i32_11] : memref<32320x1024xf32, #tpu.memory_space<any>> -> memref<1x1024xf32, #tpu.memory_space<any>>
      %c0_i32_12 = arith.constant 0 : i32
      %17 = tpu.memref_slice %arg4[%arg6, %c0_i32_12] : memref<16x1024xf32, #tpu.memory_space<vmem>> -> memref<1x1024xf32, #tpu.memory_space<vmem>>
      %18 = tpu.memref_slice %arg5[%15] : memref<8x!tpu.dma_semaphore, #tpu.memory_space<semaphore_mem>> -> memref<1x!tpu.dma_semaphore, #tpu.memory_space<semaphore_mem>>
      %19 = tpu.memref_squeeze %18 : memref<1x!tpu.dma_semaphore, #tpu.memory_space<semaphore_mem>> -> memref<!tpu.dma_semaphore, #tpu.memory_space<semaphore_mem>>
      tpu.wait_dma2 semaphore(%19 : memref<!tpu.dma_semaphore, #tpu.memory_space<semaphore_mem>>) src(%16 : memref<1x1024xf32, #tpu.memory_space<any>>) dst(%17 : memref<1x1024xf32, #tpu.memory_space<vmem>>)
    }
    %c16_i32_5 = arith.constant 16 : i32
    return
  }
  func.func @transform_1(%arg0: i32, %arg1: memref<16xi32, #tpu.memory_space<smem>>, %arg2: memref<1xi32, #tpu.memory_space<smem>>) -> (i32, i32) {
    %c0_i32 = arith.constant 0 : i32
    %c0_i32_0 = arith.constant 0 : i32
    return %arg0, %c0_i32 : i32, i32
  }
}

</mosaic_0001>

<bundles_post_ra>
// kernel: tpu_custom_call.1
= control target key start
LH: loop header
LB: loop body
LE: loop exit
PB: predicated region body
PF: predicated region fallthrough
CT: control target
= control target key end

     0   :  { %s277_s12 = smov [#allocation4]   ;;  %s349_s0 = inlined_call_operand.hbm [shape: s32[16], index: 0, kind: input, shape index: {}]   ;;  %s350_s1 = inlined_call_operand.<no memory space> [shape: s32[1], index: 1, kind: input, shape index: {}]   ;;  %s351_s2 = inlined_call_operand.hbm [shape: f32[32320,1024], index: 2, kind: input, shape index: {}]   ;;  %s352_s3 = inlined_call_operand.hbm [shape: f32[16,1024], index: 3, kind: output, shape index: {}]  }
   0x1   :  { %9 = dma.hbm_to_smem %s349_s0, 16, %s277_s12, [#allocation3] }
   0x2   :  { %263 = dma.done.wait [#allocation3], 16 }
   0x3   :  { %264 = vsyncadd [#allocation3], 4294967280 }
   0x4   :  { %12 = sfence }
   0x5   :  { %13 = vsyncpa [#allocation7], 0  ;;  %s306_s15 = smov 0  }
   0x6 LB: > { %s22_s1 = sld [smem:[#allocation4 + %s271_s15]]  ;;  %p23_p0 = scmp.lt.s32.totalorder %s271_s15, 0  ;;  %s271_s15 = sphi %s306_s15, %s20_s15  }
   0x7   : > { %s24_s0 = ssub.s32 0, %s271_s15  ;;  %s41_s16 = sshrl.u32 %s271_s15, 3 }
   0x8   : > { %s166_s17 = smin.u32 %s271_s15, %s24_s0  ;;  %s42_s18 = sand.u32 7, %s271_s15  }
   0x9   : > { %s26_s19 = sand.u32 7, %s166_s17   ;;  %s171_s20 = sshll.u32 %s41_s16, 6 }
   0xa   : > { %s27_s21 = ssub.s32 0, %s26_s19  ;;  %s44_s22 = sadd.s32 %s171_s20, %s42_s18 }
   0xb   : > { %s354_s21 = smov (!%p23_p0, %s27_s21), %s26_s19  ;;  %s45_s28 = scalar_lea.vmem [#allocation6], %s44_s22 }
   0xc   : > { %s35_s23 = sshrl.u32 %s22_s1, 3  ;;  %s36_s24 = sand.u32 7, %s22_s1  }
   0xd   : > { %p168_p1 = scmp.lt.s32.totalorder %s354_s21, 0  ;;  %s33_s25 = sadd.s32 8, %s354_s21 }
   0xe   : > { %s169_s26 = sshll.u32 %s35_s23, 6  ;;  %s48_s29 = sshll.u32 %s45_s28, 4  ;;  %s49_s29 = int_to_ptr.vmem [resolvable:$true] %s48_s29 }
   0xf   : > { %s356_s25 = smov (!%p168_p1, %s33_s25), %s354_s21  ;;  %s38_s27 = sadd.s32 %s169_s26, %s36_s24 }
  0x10   : > { %s170_s30 = sshll.u32 %s38_s27, 4  ;;  %s46_s7 = scalar_lea.sflag [#allocation2], %s356_s25 }
  0x11   : > { %s40_s6 = scalar_lea.hbm %s351_s2, %s170_s30  ;;  %s215_s11 = scalar_lea.hbm %s351_s2, 4136960 }
  0x12   : > { %s213_s8 = scalar_lea.hbm %s40_s6, 128  ;;  %p216_p3 = scmp.lt.s32.totalorder %s40_s6, %s351_s2 }
  0x13   : > { %p214_p2 = scmp.ne.s32.totalorder %s40_s6, %s213_s8  ;;  %p217_p4 = scmp.lt.s32.totalorder %s215_s11, %s213_s8 }
  0x15   : > { %p218_p5 = por %p217_p4, %p216_p3 }
  0x17   : > { %p219_p6 = pnand %p218_p5, %p214_p2 }
  0x19   : > { %222 = shalt.err (!%p219_p6)  }
  0x1a   : > { %s223_s14 = scalar_lea.vmem %s49_s29, 128  ;;  %s278_s1 = smov [#allocation6]  }
  0x1b   : > { %p224_p7 = scmp.ne.s32.totalorder %s49_s29, %s223_s14  ;;  %s225_s0 = sshll.u32 %s278_s1, 4  ;;  %s329_s0 = int_to_ptr.vmem [resolvable:$false] %s225_s0 }
  0x1c   : > { %s332_s16 = scalar_lea.vmem %s329_s0, 2048  ;;  %p228_p8 = scmp.lt.s32.totalorder %s49_s29, %s329_s0 }
  0x1d   : > { %p229_p9 = scmp.lt.s32.totalorder %s332_s16, %s223_s14 }
  0x1f   : > { %p230_p10 = por %p229_p9, %p228_p8 }
  0x21   : > { %p231_p11 = pnand %p230_p10, %p224_p7 }
  0x23   : > { %234 = shalt.err (!%p231_p11)  }
  0x24   : > { %s279_s17 = smov 128   ;;  %s280_s18 = smov 1  }
  0x25   : > { %51 = dma.hbm_to_vmem [thread:$0]  %s40_s6, 128, %s49_s29, %s46_s7, %s279_s17, %s279_s17, %s280_s18 }
  0x26   : > { %s20_s15 = sadd.s32 1, %s271_s15  }
  0x27   : > { %p17_p12 = scmp.ge.s32.totalorder %s20_s15, 16  }
  0x28   :  { %s273_s19 = smov (%p17_p12), 0  }
  0x29   :  { %19 = sbr.rel (!%p17_p12) target bundleno = 6 (0x6), region = 45 }
  0x2e LB: > { %p60_p13 = scmp.lt.s32.totalorder %s275_s19, 0  ;;  %s61_s20 = ssub.s32 0, %s275_s19  ;;  %s275_s19 = sphi %s273_s19, %s57_s19  }
  0x2f   : > { %s172_s21 = smin.u32 %s275_s19, %s61_s20 }
  0x30   : > { %s63_s22 = sand.u32 7, %s172_s21  }
  0x31   : > { %s64_s23 = ssub.s32 0, %s63_s22 }
  0x32   : > { %s358_s23 = smov (!%p60_p13, %s64_s23), %s63_s22 }
  0x33   : > { %p174_p0 = scmp.lt.s32.totalorder %s358_s23, 0  ;;  %s70_s24 = sadd.s32 8, %s358_s23 }
  0x35   : > { %s360_s24 = smov (!%p174_p0, %s70_s24), %s358_s23 }
  0x36   : > { %s72_s25 = scalar_lea.sflag [#allocation2], %s360_s24 }
  0x37   : > { %265 = dma.done.wait %s72_s25, 128 }
  0x38   : > { %266 = vsyncadd %s72_s25, 4294967168  ;;  %s57_s19 = sadd.s32 1, %s275_s19  }
  0x39   : > { %p54_p1 = scmp.ge.s32.totalorder %s57_s19, 16  }
  0x3a   :  { %p236_p2 = scmp.ne.s32.totalorder (%p54_p1), %s329_s0, %s332_s16  ;;  %p240_p3 = scmp.lt.s32.totalorder (%p54_p1), %s329_s0, %s329_s0 }
  0x3b   :  { %56 = sbr.rel (!%p54_p1) target bundleno = 46 (0x2e), region = 56  ;;  %p241_p4 = scmp.lt.s32.totalorder (%p54_p1), %s332_s16, %s332_s16 }
  0x3d   :  { %p242_p5 = por (%p54_p1), %p241_p4, %p240_p3 }
  0x3f   :  { %p243_p6 = pnand (%p54_p1), %p242_p5, %p236_p2 }
  0x41   :  { %246 = shalt.err (!%p243_p6)
}
  0x42   :  { %s281_s2 = smov 1024   ;;  %s282_s15 = smov 64  }
  0x43   :  { %87 = dma.vmem_to_hbm [thread:$0]  %s329_s0, 2048, %s352_s3, [#allocation7], %s281_s2, %s281_s2, %s282_s15  }
  0x44   :  { %267 = dma.done.wait [#allocation7], 2048  }
  0x45   :  { %268 = vsyncadd [#allocation7], 4294965248 }
  0x46   :  { %91 = vsyncpa [#allocation7], 1 }
  0x47   :  { %92 = vsyncmov [#allocation2] }
  0x4a   :  { %s93_s28 = vpop.sfrf %92 }
  0x4b   :  { %p175_p7 = scmp.ne.s32.totalorder %s93_s28, 0 }
  0x4d   :  { %97 = shalt.err (%p175_p7)  }
  0x4e   :  { %99 = vsyncmov [#allocation2 + $0x1] }
  0x51   :  { %s100_s29 = vpop.sfrf %99 }
  0x52   :  { %p176_p8 = scmp.ne.s32.totalorder %s100_s29, 0 }
  0x54   :  { %104 = shalt.err (%p176_p8)  }
  0x55   :  { %106 = vsyncmov [#allocation2 + $0x2] }
  0x58   :  { %s107_s30 = vpop.sfrf %106 }
  0x59   :  { %p177_p9 = scmp.ne.s32.totalorder %s107_s30, 0 }
  0x5b   :  { %111 = shalt.err (%p177_p9)  }
  0x5c   :  { %113 = vsyncmov [#allocation2 + $0x3] }
  0x5f   :  { %s114_s4 = vpop.sfrf %113 }
  0x60   :  { %p178_p10 = scmp.ne.s32.totalorder %s114_s4, 0 }
  0x62   :  { %118 = shalt.err (%p178_p10)  }
  0x63   :  { %120 = vsyncmov [#allocation2 + $0x4] }
  0x66   :  { %s121_s3 = vpop.sfrf %120 }
  0x67   :  { %p179_p11 = scmp.ne.s32.totalorder %s121_s3, 0 }
  0x69   :  { %125 = shalt.err (%p179_p11)  }
  0x6a   :  { %127 = vsyncmov [#allocation2 + $0x5] }
  0x6d   :  { %s128_s5 = vpop.sfrf %127 }
  0x6e   :  { %p180_p12 = scmp.ne.s32.totalorder %s128_s5, 0 }
  0x70   :  { %132 = shalt.err (%p180_p12)  }
  0x71   :  { %134 = vsyncmov [#allocation2 + $0x6] }
  0x74   :  { %s135_s6 = vpop.sfrf %134 }
  0x75   :  { %p181_p13 = scmp.ne.s32.totalorder %s135_s6, 0 }
  0x77   :  { %139 = shalt.err (%p181_p13)  }
  0x78   :  { %141 = vsyncmov [#allocation2 + $0x7] }
  0x7b   :  { %s142_s7 = vpop.sfrf %141 }
  0x7c   :  { %p182_p0 = scmp.ne.s32.totalorder %s142_s7, 0 }
  0x7e   :  { %146 = shalt.err (%p182_p0)  }

</bundles_post_ra>
